<compile_context>
chip_gen: v6e
topology: v6e:2x2x1
jax: 0.10.0
libtpu: 0.0.40
codegen_flags: <defaults>
</compile_context>

<pallas_src>
import functools
import math

import jax
import jax.numpy as jnp
from jax import lax
from jax.experimental import pallas as pl
from jax.experimental.pallas import tpu as pltpu


def mhsa_kernel(xt_ref, xq_ref, wkv_ref, bkv_ref, wq_ref, bq_ref, wo_ref, bo_ref,
                o_ref, kv_ref, acc_ref, *, head_dim, dot_dtype):
    qt = pl.program_id(1)
    h = pl.program_id(2)
    hd = head_dim
    E = wkv_ref.shape[1]

    # (1) Hoisted full-width K/V projection, once per batch step:
    #     (2E, E) @ (E, S) standard-form MXU dot filling the resident K^T/V^T scratch.
    @pl.when((qt == 0) & (h == 0))
    def _fill_kv():
        kv = jnp.dot(wkv_ref[...], xt_ref[0],
                     preferred_element_type=jnp.float32) + bkv_ref[...]   # (2E, S) f32
        kv_ref[...] = kv.astype(kv_ref.dtype)

    # (2) Init the per-(batch, q-tile) accumulator with the output bias so the finalize
    #     step is just a cast (drops the extra add).
    @pl.when(h == 0)
    def _init_acc():
        acc_ref[...] = jnp.broadcast_to(bo_ref[...], acc_ref.shape).astype(jnp.float32)

    # (3) Per-head query projection for this q tile (1/sqrt(hd) folded into Wq/bq).
    xq = xq_ref[0].astype(dot_dtype)                                        # (tq, E)
    q = (jnp.dot(xq, wq_ref[h], preferred_element_type=jnp.float32)
         + bq_ref[h]).astype(dot_dtype)                                     # (tq, hd)

    # (4) Per-head K^T / V^T slices of the resident scratch (dynamic sublane slice,
    #     full lane dim).
    k0 = pl.multiple_of(h * hd, hd)
    v0 = pl.multiple_of(E + h * hd, hd)
    k_t = kv_ref[pl.ds(k0, hd), :]                                          # (hd, S)
    v_t = kv_ref[pl.ds(v0, hd), :]                                          # (hd, S)

    # (5) Scores: (tq, hd) @ (hd, S) — standard MXU form, no materialized transpose.
    s = jnp.dot(q, k_t, preferred_element_type=jnp.float32)                 # (tq, S) f32

    # (6) Softmax in f32: max-subtract, EUP exp, EUP approx reciprocal (no VPU divide).
    s = s - jnp.max(s, axis=-1, keepdims=True)
    p = jnp.exp(s)
    p = p * pl.reciprocal(jnp.sum(p, axis=-1, keepdims=True), approx=True)

    # (7) ctx = P @ V: contract the S dims of (tq, S) and (hd, S) directly.
    ctx = lax.dot_general(p.astype(dot_dtype), v_t,
                          dimension_numbers=(((1,), (1,)), ((), ())),
                          preferred_element_type=jnp.float32)               # (tq, hd)

    # (8) Per-head slice of the output projection, accumulated across the head axis.
    acc_ref[...] += jnp.dot(ctx.astype(dot_dtype), wo_ref[h],
                            preferred_element_type=jnp.float32)             # (tq, E)

    @pl.when(h == pl.num_programs(2) - 1)
    def _finalize():
        o_ref[0] = acc_ref[...].astype(o_ref.dtype)


def _pack_params(p, num_heads, compute_dtype):
    """Repack [in, out] Linear params into resident, head-addressable tensors."""
    E = p["wq"].shape[0]
    hd = E // num_heads
    inv_scale = 1.0 / math.sqrt(hd)

    # K/V weights transposed + stacked row-wise: rows [K^T head-major ; V^T head-major].
    wkv_t = jnp.concatenate([p["wk"].T, p["wv"].T], axis=0).astype(compute_dtype)  # (2E, E)
    bkv = jnp.concatenate([p["bk"].reshape(E, 1), p["bv"].reshape(E, 1)],
                          axis=0).astype(jnp.float32)                               # (2E, 1)

    # Q weights head-leading with 1/sqrt(hd) folded in.
    wq = (p["wq"] * inv_scale).reshape(E, num_heads, hd).transpose(1, 0, 2) \
        .astype(compute_dtype)                                                      # (H, E, hd)
    bq = (p["bq"] * inv_scale).reshape(1, num_heads, hd).transpose(1, 0, 2) \
        .astype(jnp.float32)                                                        # (H, 1, hd)

    # Output projection row blocks per head.
    wo = p["wo"].reshape(num_heads, hd, E).astype(compute_dtype)                    # (H, hd, E)
    bo = p["bo"].astype(jnp.float32)                                                # (1, E)
    return wkv_t, bkv, wq, bq, wo, bo


def _choose_q_tile(S, max_tq=512):
    """Largest query tile <= max_tq that divides S (prefer multiples of 8)."""
    if S <= max_tq:
        return S
    for t in range(max_tq, 7, -1):
        if S % t == 0 and t % 8 == 0:
            return t
    return S   # fall back to untiled queries


def _vmem_limit_bytes():
    """Generation-aware VMEM limit (~3/4 of physical, clamped)."""
    try:
        cap = pltpu.get_tpu_info().vmem_capacity_bytes
    except Exception:
        cap = 64 * 1024 * 1024
    return int(max(32 * 1024 * 1024, min(cap * 3 // 4, 96 * 1024 * 1024)))


def mhsa_forward(x, params, *, num_heads, compute_dtype=jnp.float32, max_q_tile=512):
    B, S, E = x.shape
    assert E % num_heads == 0
    hd = E // num_heads
    q_tile = _choose_q_tile(S, max_q_tile)
    num_qt = S // q_tile

    wkv_t, bkv, wq, bq, wo, bo = _pack_params(params, num_heads, compute_dtype)
    x_c = x.astype(compute_dtype)
    x_t = x_c.transpose(0, 2, 1)                       # (B, E, S) for the K/V fill dot

    kernel = functools.partial(mhsa_kernel, head_dim=hd, dot_dtype=compute_dtype)

    itemsize = jnp.dtype(compute_dtype).itemsize
    flops = 2 * B * S * E * (4 * E + 2 * S)            # qkv proj + scores + ctx + out proj
    transcendentals = B * num_heads * S * (S + 1)      # exp + reciprocal
    bytes_accessed = (2 * B * S * E * itemsize                               # x^T + per-tile x
                      + B * S * E * jnp.dtype(x.dtype).itemsize              # output
                      + (wkv_t.size + wq.size + wo.size) * itemsize          # resident weights (once)
                      + (bkv.size + bq.size + bo.size) * 4)

    return pl.pallas_call(
        kernel,
        out_shape=jax.ShapeDtypeStruct((B, S, E), x.dtype),
        grid_spec=pltpu.PrefetchScalarGridSpec(
            num_scalar_prefetch=0,
            grid=(B, num_qt, num_heads),
            in_specs=[
                pl.BlockSpec((1, E, S), lambda b, qt, h: (b, 0, 0)),           # x^T (per batch, K/V fill)
                pl.BlockSpec((1, q_tile, E), lambda b, qt, h: (b, qt, 0)),     # x   (per q tile, Q proj)
                pl.BlockSpec((2 * E, E), lambda b, qt, h: (0, 0)),             # [Wk;Wv]^T  resident
                pl.BlockSpec((2 * E, 1), lambda b, qt, h: (0, 0)),             # [bk;bv]    resident
                pl.BlockSpec((num_heads, E, hd), lambda b, qt, h: (0, 0, 0)),  # Wq (scaled) resident
                pl.BlockSpec((num_heads, 1, hd), lambda b, qt, h: (0, 0, 0)),  # bq (scaled) resident
                pl.BlockSpec((num_heads, hd, E), lambda b, qt, h: (0, 0, 0)),  # Wo row blocks resident
                pl.BlockSpec((1, E), lambda b, qt, h: (0, 0)),                 # bo
            ],
            out_specs=pl.BlockSpec((1, q_tile, E), lambda b, qt, h: (b, qt, 0)),
            scratch_shapes=[
                pltpu.VMEM((2 * E, S), compute_dtype),      # resident K^T / V^T
                pltpu.VMEM((q_tile, E), jnp.float32),       # f32 head accumulator
            ],
        ),
        compiler_params=pltpu.CompilerParams(
            dimension_semantics=("parallel", "arbitrary", "arbitrary"),
            vmem_limit_bytes=_vmem_limit_bytes(),
        ),
        cost_estimate=pl.CostEstimate(flops=flops, transcendentals=transcendentals,
                                      bytes_accessed=bytes_accessed),
    )(x_t, x_c, wkv_t, bkv, wq, bq, wo, bo)


# ---------------- Pure-JAX reference (PyTorch semantics, for verification) ----------------
def mhsa_ref(x, p, num_heads):
    B, S, E = x.shape
    hd = E // num_heads
    q = x @ p["wq"] + p["bq"]
    k = x @ p["wk"] + p["bk"]
    v = x @ p["wv"] + p["bv"]
    q = q.reshape(B, S, num_heads, hd).transpose(0, 2, 1, 3)
    k = k.reshape(B, S, num_heads, hd).transpose(0, 2, 1, 3)
    v = v.reshape(B, S, num_heads, hd).transpose(0, 2, 1, 3)
    scores = jnp.einsum("bhqd,bhkd->bhqk", q, k) / math.sqrt(hd)
    attn = jax.nn.softmax(scores, axis=-1)
    ctx = jnp.einsum("bhqk,bhkd->bhqd", attn, v).transpose(0, 2, 1, 3).reshape(B, S, E)
    return ctx @ p["wo"] + p["bo"]


def init_params(key, embed_dim):
    ks = jax.random.split(key, 8)
    bnd = 1.0 / math.sqrt(embed_dim)
    u = lambda k, shape: jax.random.uniform(k, shape, jnp.float32, -bnd, bnd)
    return {
        "wq": u(ks[0], (embed_dim, embed_dim)), "bq": u(ks[1], (1, embed_dim)),
        "wk": u(ks[2], (embed_dim, embed_dim)), "bk": u(ks[3], (1, embed_dim)),
        "wv": u(ks[4], (embed_dim, embed_dim)), "bv": u(ks[5], (1, embed_dim)),
        "wo": u(ks[6], (embed_dim, embed_dim)), "bo": u(ks[7], (1, embed_dim)),
    }


if __name__ == "__main__":
    B, S, E, H = 2, 8, 32, 4

    key = jax.random.PRNGKey(0)
    kx, kp = jax.random.split(key)
    x = jax.random.normal(kx, (B, S, E), jnp.float32)
    params = init_params(kp, E)

    ref = jax.block_until_ready(mhsa_ref(x, params, H))

    # Full-precision path (approx EUP reciprocal only perturbs low bits of the softmax).
    out_f32 = jax.block_until_ready(mhsa_forward(x, params, num_heads=H,
                                                 compute_dtype=jnp.float32))
    assert out_f32.shape == (B, S, E)
    assert jnp.allclose(out_f32, ref, atol=5e-3, rtol=5e-3), "f32 kernel mismatch vs reference"

    # bf16 MXU-operand path (f32 accumulation / softmax) for v6e/v7x.
    out_bf16 = jax.block_until_ready(mhsa_forward(x, params, num_heads=H,
                                                  compute_dtype=jnp.bfloat16))
    assert out_bf16.shape == (B, S, E)
    assert jnp.allclose(out_bf16, ref, atol=3e-2, rtol=3e-2), "bf16 kernel mismatch vs reference"

    print("KERNEL_OK")
</pallas_src>

<mosaic_0001>
module attributes {stable_mosaic.version = 11 : i64} {
  func.func @mhsa_kernel(%arg0: i32, %arg1: i32, %arg2: i32, %arg3: memref<1x32x8xf32, #tpu.memory_space<vmem>>, %arg4: memref<1x8x32xf32, #tpu.memory_space<vmem>>, %arg5: memref<64x32xf32, #tpu.memory_space<vmem>>, %arg6: memref<64x1xf32, #tpu.memory_space<vmem>>, %arg7: memref<4x32x8xf32, #tpu.memory_space<vmem>>, %arg8: memref<4x1x8xf32, #tpu.memory_space<vmem>>, %arg9: memref<4x8x32xf32, #tpu.memory_space<vmem>>, %arg10: memref<1x32xf32, #tpu.memory_space<vmem>>, %arg11: memref<1x8x32xf32, #tpu.memory_space<vmem>>, %arg12: memref<64x8xf32, #tpu.memory_space<vmem>>, %arg13: memref<8x32xf32, #tpu.memory_space<vmem>>) attributes {dimension_semantics = [#tpu.dimension_semantics<parallel>, #tpu.dimension_semantics<arbitrary>, #tpu.dimension_semantics<arbitrary>], iteration_bounds = array<i64: 2, 1, 4>, scalar_prefetch = 0 : i64, scratch_operands = 2 : i64, tpu.core_type = #tpu.core_type<tc>, window_params = [{transform_indices = @transform_0, window_bounds = array<i64: 1, 32, 8>}, {transform_indices = @transform_1, window_bounds = array<i64: 1, 8, 32>}, {pipeline_mode = #tpu.pipeline_mode<synchronous>, transform_indices = @transform_2, window_bounds = array<i64: 64, 32>}, {pipeline_mode = #tpu.pipeline_mode<synchronous>, transform_indices = @transform_3, window_bounds = array<i64: 64, 1>}, {pipeline_mode = #tpu.pipeline_mode<synchronous>, transform_indices = @transform_4, window_bounds = array<i64: 4, 32, 8>}, {pipeline_mode = #tpu.pipeline_mode<synchronous>, transform_indices = @transform_5, window_bounds = array<i64: 4, 1, 8>}, {pipeline_mode = #tpu.pipeline_mode<synchronous>, transform_indices = @transform_6, window_bounds = array<i64: 4, 8, 32>}, {pipeline_mode = #tpu.pipeline_mode<synchronous>, transform_indices = @transform_7, window_bounds = array<i64: 1, 32>}, {transform_indices = @transform_8, window_bounds = array<i64: 1, 8, 32>}]} {
    %c0_i32 = arith.constant 0 : i32
    %0 = arith.cmpi eq, %arg1, %c0_i32 : i32
    %c0_i32_0 = arith.constant 0 : i32
    %1 = arith.cmpi eq, %arg2, %c0_i32_0 : i32
    %2 = arith.andi %0, %1 : i1
    %3 = arith.extui %2 : i1 to i32
    %c0_i32_1 = arith.constant 0 : i32
    %4 = arith.cmpi ne, %3, %c0_i32_1 : i32
    scf.if %4 {
      %c0_25 = arith.constant 0 : index
      %c0_26 = arith.constant 0 : index
      %50 = vector.load %arg5[%c0_25, %c0_26] : memref<64x32xf32, #tpu.memory_space<vmem>>, vector<64x32xf32>
      %c0_27 = arith.constant 0 : index
      %c0_28 = arith.constant 0 : index
      %c0_29 = arith.constant 0 : index
      %51 = vector.load %arg3[%c0_27, %c0_28, %c0_29] : memref<1x32x8xf32, #tpu.memory_space<vmem>>, vector<1x32x8xf32>
      %52 = vector.shape_cast %51 : vector<1x32x8xf32> to vector<32x8xf32>
      %cst_30 = arith.constant dense<0.000000e+00> : vector<64x8xf32>
      %53 = tpu.matmul %50, %52, %cst_30 {dimension_numbers = #tpu.dot_dimension_numbers<[1], [0], [0], [1], [0, 0, 1, 1], [], []>} : vector<64x32xf32>, vector<32x8xf32>, vector<64x8xf32> -> vector<64x8xf32>
      %c0_31 = arith.constant 0 : index
      %c0_32 = arith.constant 0 : index
      %54 = vector.load %arg6[%c0_31, %c0_32] : memref<64x1xf32, #tpu.memory_space<vmem>>, vector<64x1xf32>
      %55 = vector.broadcast %54 : vector<64x1xf32> to vector<64x8xf32>
      %56 = arith.addf %53, %55 : vector<64x8xf32>
      %c0_33 = arith.constant 0 : index
      %c0_34 = arith.constant 0 : index
      %57 = vector.load %arg12[%c0_33, %c0_34] : memref<64x8xf32, #tpu.memory_space<vmem>>, vector<64x8xf32>
      tpu.vector_store %arg12[%c0_33, %c0_34], %56 {strides = array<i32>} : memref<64x8xf32, #tpu.memory_space<vmem>>, vector<64x8xf32>,
    } else {
    }
    %c0_i32_2 = arith.constant 0 : i32
    %5 = arith.cmpi eq, %arg2, %c0_i32_2 : i32
    %6 = arith.extui %5 : i1 to i32
    %c0_i32_3 = arith.constant 0 : i32
    %7 = arith.cmpi ne, %6, %c0_i32_3 : i32
    scf.if %7 {
      %c0_25 = arith.constant 0 : index
      %c0_26 = arith.constant 0 : index
      %50 = vector.load %arg10[%c0_25, %c0_26] : memref<1x32xf32, #tpu.memory_space<vmem>>, vector<1x32xf32>
      %51 = vector.shape_cast %50 : vector<1x32xf32> to vector<1x32xf32>
      %52 = vector.broadcast %51 : vector<1x32xf32> to vector<8x32xf32>
      %c0_27 = arith.constant 0 : index
      %c0_28 = arith.constant 0 : index
      %53 = vector.load %arg13[%c0_27, %c0_28] : memref<8x32xf32, #tpu.memory_space<vmem>>, vector<8x32xf32>
      tpu.vector_store %arg13[%c0_27, %c0_28], %52 {strides = array<i32>} : memref<8x32xf32, #tpu.memory_space<vmem>>, vector<8x32xf32>,
    } else {
    }
    %c0 = arith.constant 0 : index
    %c0_4 = arith.constant 0 : index
    %c0_5 = arith.constant 0 : index
    %8 = vector.load %arg4[%c0, %c0_4, %c0_5] : memref<1x8x32xf32, #tpu.memory_space<vmem>>, vector<1x8x32xf32>
    %9 = vector.shape_cast %8 : vector<1x8x32xf32> to vector<8x32xf32>
    %10 = arith.index_cast %arg2 : i32 to index
    %c0_6 = arith.constant 0 : index
    %c0_7 = arith.constant 0 : index
    %11 = vector.load %arg7[%10, %c0_6, %c0_7] : memref<4x32x8xf32, #tpu.memory_space<vmem>>, vector<1x32x8xf32>
    %12 = vector.shape_cast %11 : vector<1x32x8xf32> to vector<32x8xf32>
    %cst = arith.constant dense<0.000000e+00> : vector<8x8xf32>
    %13 = tpu.matmul %9, %12, %cst {dimension_numbers = #tpu.dot_dimension_numbers<[1], [0], [0], [1], [0, 0, 1, 1], [], []>} : vector<8x32xf32>, vector<32x8xf32>, vector<8x8xf32> -> vector<8x8xf32>
    %14 = arith.index_cast %arg2 : i32 to index
    %c0_8 = arith.constant 0 : index
    %c0_9 = arith.constant 0 : index
    %15 = vector.load %arg8[%14, %c0_8, %c0_9] : memref<4x1x8xf32, #tpu.memory_space<vmem>>, vector<1x1x8xf32>
    %16 = vector.shape_cast %15 : vector<1x1x8xf32> to vector<1x8xf32>
    %17 = vector.broadcast %16 : vector<1x8xf32> to vector<8x8xf32>
    %18 = arith.addf %13, %17 : vector<8x8xf32>
    %c8_i32 = arith.constant 8 : i32
    %19 = arith.muli %arg2, %c8_i32 : i32
    %20 = tpu.assume_multiple %19, 8 : i32
    %c8_i32_10 = arith.constant 8 : i32
    %21 = arith.muli %arg2, %c8_i32_10 : i32
    %c32_i32 = arith.constant 32 : i32
    %22 = arith.addi %c32_i32, %21 : i32
    %23 = tpu.assume_multiple %22, 8 : i32
    %24 = arith.index_cast %20 : i32 to index
    %c0_11 = arith.constant 0 : index
    %25 = vector.load %arg12[%24, %c0_11] : memref<64x8xf32, #tpu.memory_space<vmem>>, vector<8x8xf32>
    %26 = arith.index_cast %23 : i32 to index
    %c0_12 = arith.constant 0 : index
    %27 = vector.load %arg12[%26, %c0_12] : memref<64x8xf32, #tpu.memory_space<vmem>>, vector<8x8xf32>
    %cst_13 = arith.constant dense<0.000000e+00> : vector<8x8xf32>
    %28 = tpu.matmul %18, %25, %cst_13 {dimension_numbers = #tpu.dot_dimension_numbers<[1], [0], [0], [1], [0, 0, 1, 1], [], []>} : vector<8x8xf32>, vector<8x8xf32>, vector<8x8xf32> -> vector<8x8xf32>
    %cst_14 = arith.constant dense<0xFF800000> : vector<8xf32>
    %29 = vector.multi_reduction <maximumf>, %28, %cst_14 [1] : vector<8x8xf32> to vector<8xf32>
    %30 = vector.shape_cast %29 : vector<8xf32> to vector<8x1xf32>
    %31 = vector.broadcast %30 : vector<8x1xf32> to vector<8x8xf32>
    %32 = arith.subf %28, %31 : vector<8x8xf32>
    %33 = math.exp %32 : vector<8x8xf32>
    %cst_15 = arith.constant dense<0.000000e+00> : vector<8xf32>
    %34 = vector.multi_reduction <add>, %33, %cst_15 [1] : vector<8x8xf32> to vector<8xf32>
    %35 = vector.shape_cast %34 : vector<8xf32> to vector<8x1xf32>
    %36 = tpu.reciprocal %35 {approx = true} : vector<8x1xf32> -> vector<8x1xf32>
    %37 = vector.broadcast %36 : vector<8x1xf32> to vector<8x8xf32>
    %38 = arith.mulf %33, %37 : vector<8x8xf32>
    %cst_16 = arith.constant dense<0.000000e+00> : vector<8x8xf32>
    %39 = tpu.matmul %38, %27, %cst_16 {dimension_numbers = #tpu.dot_dimension_numbers<[1], [1], [0], [0], [0, 0, 1, 0], [], []>} : vector<8x8xf32>, vector<8x8xf32>, vector<8x8xf32> -> vector<8x8xf32>
    %c0_17 = arith.constant 0 : index
    %c0_18 = arith.constant 0 : index
    %40 = vector.load %arg13[%c0_17, %c0_18] : memref<8x32xf32, #tpu.memory_space<vmem>>, vector<8x32xf32>
    %41 = arith.index_cast %arg2 : i32 to index
    %c0_19 = arith.constant 0 : index
    %c0_20 = arith.constant 0 : index
    %42 = vector.load %arg9[%41, %c0_19, %c0_20] : memref<4x8x32xf32, #tpu.memory_space<vmem>>, vector<1x8x32xf32>
    %43 = vector.shape_cast %42 : vector<1x8x32xf32> to vector<8x32xf32>
    %cst_21 = arith.constant dense<0.000000e+00> : vector<8x32xf32>
    %44 = tpu.matmul %39, %43, %cst_21 {dimension_numbers = #tpu.dot_dimension_numbers<[1], [0], [0], [1], [0, 0, 1, 1], [], []>} : vector<8x8xf32>, vector<8x32xf32>, vector<8x32xf32> -> vector<8x32xf32>
    %45 = arith.addf %40, %44 : vector<8x32xf32>
    %c0_22 = arith.constant 0 : index
    %c0_23 = arith.constant 0 : index
    %46 = vector.load %arg13[%c0_22, %c0_23] : memref<8x32xf32, #tpu.memory_space<vmem>>, vector<8x32xf32>
    tpu.vector_store %arg13[%c0_22, %c0_23], %45 {strides = array<i32>} : memref<8x32xf32, #tpu.memory_space<vmem>>, vector<8x32xf32>,
    %c3_i32 = arith.constant 3 : i32
    %47 = arith.cmpi eq, %arg2, %c3_i32 : i32
    %48 = arith.extui %47 : i1 to i32
    %c0_i32_24 = arith.constant 0 : i32
    %49 = arith.cmpi ne, %48, %c0_i32_24 : i32
    scf.if %49 {
      %c0_25 = arith.constant 0 : index
      %c0_26 = arith.constant 0 : index
      %50 = vector.load %arg13[%c0_25, %c0_26] : memref<8x32xf32, #tpu.memory_space<vmem>>, vector<8x32xf32>
      %c0_27 = arith.constant 0 : index
      %c0_28 = arith.constant 0 : index
      %c0_29 = arith.constant 0 : index
      %51 = vector.load %arg11[%c0_27, %c0_28, %c0_29] : memref<1x8x32xf32, #tpu.memory_space<vmem>>, vector<1x8x32xf32>
      %52 = vector.shape_cast %51 : vector<1x8x32xf32> to vector<8x32xf32>
      %53 = vector.shape_cast %50 : vector<8x32xf32> to vector<1x8x32xf32>
      tpu.vector_store %arg11[%c0_27, %c0_28, %c0_29], %53 {strides = array<i32>} : memref<1x8x32xf32, #tpu.memory_space<vmem>>, vector<1x8x32xf32>,
    } else {
    }
    return
  }
  func.func @transform_0(%arg0: i32, %arg1: i32, %arg2: i32) -> (i32, i32, i32) {
    %c0_i32 = arith.constant 0 : i32
    %c0_i32_0 = arith.constant 0 : i32
    %c0_i32_1 = arith.constant 0 : i32
    return %arg0, %c0_i32, %c0_i32_0 : i32, i32, i32
  }
  func.func @transform_1(%arg0: i32, %arg1: i32, %arg2: i32) -> (i32, i32, i32) {
    %c0_i32 = arith.constant 0 : i32
    %c0_i32_0 = arith.constant 0 : i32
    return %arg0, %arg1, %c0_i32 : i32, i32, i32
  }
  func.func @transform_2(%arg0: i32, %arg1: i32, %arg2: i32) -> (i32, i32) {
    %c0_i32 = arith.constant 0 : i32
    %c0_i32_0 = arith.constant 0 : i32
    %c0_i32_1 = arith.constant 0 : i32
    return %c0_i32, %c0_i32_0 : i32, i32
  }
  func.func @transform_3(%arg0: i32, %arg1: i32, %arg2: i32) -> (i32, i32) {
    %c0_i32 = arith.constant 0 : i32
    %c0_i32_0 = arith.constant 0 : i32
    %c0_i32_1 = arith.constant 0 : i32
    return %c0_i32, %c0_i32_0 : i32, i32
  }
  func.func @transform_4(%arg0: i32, %arg1: i32, %arg2: i32) -> (i32, i32, i32) {
    %c0_i32 = arith.constant 0 : i32
    %c0_i32_0 = arith.constant 0 : i32
    %c0_i32_1 = arith.constant 0 : i32
    %c0_i32_2 = arith.constant 0 : i32
    return %c0_i32, %c0_i32_0, %c0_i32_1 : i32, i32, i32
  }
  func.func @transform_5(%arg0: i32, %arg1: i32, %arg2: i32) -> (i32, i32, i32) {
    %c0_i32 = arith.constant 0 : i32
    %c0_i32_0 = arith.constant 0 : i32
    %c0_i32_1 = arith.constant 0 : i32
    %c0_i32_2 = arith.constant 0 : i32
    return %c0_i32, %c0_i32_0, %c0_i32_1 : i32, i32, i32
  }
  func.func @transform_6(%arg0: i32, %arg1: i32, %arg2: i32) -> (i32, i32, i32) {
    %c0_i32 = arith.constant 0 : i32
    %c0_i32_0 = arith.constant 0 : i32
    %c0_i32_1 = arith.constant 0 : i32
    %c0_i32_2 = arith.constant 0 : i32
    return %c0_i32, %c0_i32_0, %c0_i32_1 : i32, i32, i32
  }
  func.func @transform_7(%arg0: i32, %arg1: i32, %arg2: i32) -> (i32, i32) {
    %c0_i32 = arith.constant 0 : i32
    %c0_i32_0 = arith.constant 0 : i32
    %c0_i32_1 = arith.constant 0 : i32
    return %c0_i32, %c0_i32_0 : i32, i32
  }
  func.func @transform_8(%arg0: i32, %arg1: i32, %arg2: i32) -> (i32, i32, i32) {
    %c0_i32 = arith.constant 0 : i32
    %c0_i32_0 = arith.constant 0 : i32
    return %arg0, %arg1, %c0_i32 : i32, i32, i32
  }
}

</mosaic_0001>

<bundles_post_ra>
// kernel: tpu_custom_call.1
= control target key start
LH: loop header
LB: loop body
LE: loop exit
PB: predicated region body
PF: predicated region fallthrough
CT: control target
= control target key end

     0   :  { %13 = vsyncpa [#allocation5], 0  ;;  %s1596_s0 = inlined_call_operand.vmem [shape: f32[2,32,8], index: 0, kind: input, shape index: {}]   ;;  %s1597_s1 = inlined_call_operand.vmem [shape: f32[2,8,32], index: 1, kind: input, shape index: {}]   ;;  %s1598_s2 = inlined_call_operand.vmem [shape: f32[64,32], index: 2, kind: input, shape index: {}]   ;;  %s1599_s3 = inlined_call_operand.vmem [shape: f32[64,1], index: 3, kind: input, shape index: {}]   ;;  %s1600_s4 = inlined_call_operand.vmem [shape: f32[4,32,8], index: 4, kind: input, shape index: {}]   ;;  %s1601_s5 = inlined_call_operand.vmem [shape: f32[4,1,8], index: 5, kind: input, shape index: {}]   ;;  %s1602_s6 = inlined_call_operand.vmem [shape: f32[4,8,32], index: 6, kind: input, shape index: {}]   ;;  %s1603_s7 = inlined_call_operand.vmem [shape: f32[1,32], index: 7, kind: input, shape index: {}]   ;;  %s1604_s8 = inlined_call_operand.hbm [shape: f32[2,8,32], index: 8, kind: output, shape index: {}]  }
   0x1   :  { %15 = vsyncpa [#allocation5 + $0x1], 0  ;;  %s1361_s27 = smov 0   ;;  %s1363_s28 = smov 0  }
   0x2   :  { %s1365_s29 = smov 0   ;;  %s1367_s30 = smov 0  }
   0x3   :  { %s1369_s9 = smov 0   ;;  %s1371_s10 = smov 0  }
   0x4   :  { %s1373_s11 = smov 0   ;;  %s1375_s12 = smov 0  }
   0x5 LB: > { %1608 = sst [smem:[#allocation7_spill]] %s1306_s11  ;;  %s1024_s13 = sadd.s32 4294967295, %s1310_s12   ;;  %s1310_s12 = sphi %s1375_s12, %s21_s12   ;;  %s1306_s11 = sphi %s1373_s11, %s1618_s11   ;;  %s1302_s10 = sphi %s1371_s10, %s1623_s10   ;;  %s1298_s9 = sphi %s1369_s9, %s1616_s9   ;;  %s1294_s30 = sphi %s1367_s30, %s1622_s30   ;;  %s1290_s29 = sphi %s1365_s29, %s1621_s29   ;;  %s1286_s28 = sphi %s1363_s28, %s1620_s28   ;;  %s1282_s27 = sphi %s1361_s27, %s1619_s27  }
   0x6   : > { %s1025_s14 = sadd.s32 4294967294, %s1310_s12   ;;  %s33_s15 = sadd.s32 1, %s1302_s10 }
   0x7   : > { %p34_p0 = scmp.ge.s32.totalorder %s33_s15, 4  ;;  %s40_s16 = sadd.s32 1, %s1306_s11 }
   0x8   : > { %p239_p1 = scmp.ne.s32.totalorder %s1290_s29, %s1286_s28  ;;  %p240_p2 = scmp.eq.s32.totalorder %s1024_s13, 7 }
   0x9   : > { %s1625_s15 = smov (%p34_p0, %s33_s15), 0  ;;  %s1627_s16 = smov (!%p34_p0, %s40_s16), %s1306_s11 }
   0xa   : > { %1609 = sst [smem:[#allocation8_spill]] %s1625_s15  ;;  %p1410_p3 = por %p240_p2, %p239_p1 }
   0xb   : > { %p245_p4 = scmp.ne.s32.totalorder %s1286_s28, %s1282_s27  ;;  %p42_p5 = scmp.ge.s32.totalorder %s1627_s16, 2 }
   0xc   : > { %p246_p6 = scmp.eq.s32.totalorder %s1025_s14, 7  ;;  %p1028_p7 = scmp.ge.s32.totalorder %s1310_s12, 1 }
   0xd   : > { %p300_p8 = scmp.lt.s32.totalorder %s1310_s12, 9  ;;  %s1629_s16 = smov (%p42_p5, %s1627_s16), 0 }
   0xe   : > { %1611 = sst [smem:[#allocation9_spill]] %s1629_s16  ;;  %p1420_p9 = por %p246_p6, %p245_p4 }
   0xf   : > { %p301_p10 = pnand %p1028_p7, %p300_p8  ;;  %s224_s19 = ssub.s32 %s1306_s11, %s1629_s16 }
  0x10   : > { %s229_s20 = sadd.s32 1, %s1290_s29  ;;  %p227_p11 = scmp.eq.s32.totalorder %s224_s19, 0 }
  0x11   : > { %304 = sbr.rel (%p301_p10) target bundleno = 1378 (0x562), region = 52  ;;  %s1607_s22 = sand.u32 (!%p301_p10), 1, %s1286_s28  }
  0x12   : > { %s1428_s21 = scalar_select %p227_p11, %s1290_s29, %s229_s20  }
  0x13   : > { %p341_p12 = scmp.lt.s32.totalorder (!%p301_p10), %s1298_s9, 1  ;;  %s1434_s23 = sshll.u32 (!%p301_p10), %s1607_s22, 3 }
  0x14   : > { %p354_p13 = scmp.eq.s32.totalorder (!%p301_p10), %s1294_s30, 0 }
  0x16   : > { %s342_s24 = scalar_select %p341_p12, %s1298_s9, 1  ;;  %v359_v4 = vld [vmem:[%s1598_s2] sm:$0xff] (%p354_p13)  ;;  %vm419_vm0 = vcmask (%p354_p13), 261120   ;;  %v360_v6 = vld [vmem:[%s1598_s2 + $0x8] sm:$0xff] (%p354_p13)  ;;  %v361_v8 = vld [vmem:[%s1598_s2 + $0x10] sm:$0xff] (%p354_p13)  ;;  %v1312_v14 = vmov (%p354_p13), 0  }
  0x17   : > { %358 = sbr.rel (!%p354_p13) target bundleno = 237 (0xed), region = 56  ;;  %v363_v5 = vld [vmem:[%s1598_s2 + $0x20] sm:$0xff] (%p354_p13)  ;;  %v364_v7 = vld [vmem:[%s1598_s2 + $0x28] sm:$0xff] (%p354_p13)  ;;  %v365_v9 = vld [vmem:[%s1598_s2 + $0x30] sm:$0xff] (%p354_p13)  ;;  %1092 = vmatprep.mubr.msk.f32.mxu0 (%p354_p13), %vm419_vm0, %v359_v4  ;;  %1213 = vset.pattern.permute.xlu1 (%p354_p13), %v1312_v14  ;;  %vm549_vm1 = vcmask (%p354_p13), 64512  }
  0x18   : > { %s1059_s25 = sshll.u32 %s342_s24, 5  ;;  %s1032_s26 = sshll.u32 %s342_s24, 3  ;;  %1098 = vmatprep.mubr.msk.f32.mxu1 (%p354_p13), %vm419_vm0, %v363_v5  ;;  %v373_v10 = vld [vmem:[%s1599_s3 + $0x10] sm:$0xff] (%p354_p13)  ;;  %v371_v11 = vld [vmem:[%s1599_s3] sm:$0xff] (%p354_p13)  ;;  %v362_v12 = vld [vmem:[%s1598_s2 + $0x18] sm:$0xff] (%p354_p13)  ;;  %1212 = vset.pattern.permute.xlu0 (%p354_p13), %v1312_v14 }
  0x19   : > { %s345_s19 = scalar_lea.vmem %s1596_s0, %s1059_s25  ;;  %s1444_s15 = scalar_lea.vmem %s1597_s1, %s1032_s26  ;;  %v366_v13 = vld [vmem:[%s1598_s2 + $0x38] sm:$0xff] (%p354_p13)  ;;  %391 = vperm.xlu1 (%p354_p13), %1213, %v373_v10   ;;  %381 = vperm.xlu0 (%p354_p13), %1212, %v371_v11   ;;  %v372_v16 = vld [vmem:[%s1599_s3 + $0x8] sm:$0xff] (%p354_p13)  ;;  %v375_v18 = vld [vmem:[%s1599_s3 + $0x20] sm:$0xff] (%p354_p13) }
  0x1a   : > { %v370_v0 = vld [vmem:[%s345_s19 + $0x18] sm:$0xff] (%p354_p13)  ;;  %v369_v1 = vld [vmem:[%s345_s19 + $0x10] sm:$0xff] (%p354_p13)  ;;  %v368_v2 = vld [vmem:[%s345_s19 + $0x8] sm:$0xff] (%p354_p13) }
  0x1b   : > { %1084 = vmatprep.subr.mxu0 (%p354_p13), %v370_v0  ;;  %1130 = vmatprep.subr.mxu1 (%p354_p13), %v370_v0  ;;  %v367_v3 = vld [vmem:[%s345_s19] sm:$0xff] (%p354_p13)  ;;  %v374_v15 = vld [vmem:[%s1599_s3 + $0x18] sm:$0xff] (%p354_p13)  ;;  %v376_v17 = vld [vmem:[%s1599_s3 + $0x28] sm:$0xff] (%p354_p13) }
  0x1c   : > { %1085 = vmatpush3.msra.mxu0 %v370_v0  ;;  %1134 = vmatpush3.msra.mxu1 %v370_v0  ;;  %v378_v19 = vld [vmem:[%s1599_s3 + $0x38] sm:$0xff]  ;;  %v377_v20 = vld [vmem:[%s1599_s3 + $0x30] sm:$0xff] }
  0x1d   : > { %1086 = vmatprep.subr.mxu0 %v369_v1  ;;  %1131 = vmatprep.subr.mxu1 %v369_v1 }
  0x1e   : > { %1087 = vmatpush3.msra.mxu0 %v369_v1  ;;  %1135 = vmatpush3.msra.mxu1 %v369_v1 }
  0x1f   : > { %1088 = vmatprep.subr.mxu0 %v368_v2  ;;  %1132 = vmatprep.subr.mxu1 %v368_v2 }
  0x20   : > { %1089 = vmatpush3.msra.mxu0 %v368_v2  ;;  %1136 = vmatpush3.msra.mxu1 %v368_v2 }
  0x21   : > { %1090 = vmatprep.subr.mxu0 %v367_v3  ;;  %1133 = vmatprep.subr.mxu1 %v367_v3 }
  0x22   : > { %1091 = vmatpush3.msra.mxu0 %v367_v3  ;;  %1137 = vmatpush3.msra.mxu1 %v367_v3 }
  0x23   : > { %1093 = vmatmul.mubr.msk.f32.vlgmr.msra.gmra.mxu0 %vm419_vm0, %v360_v6  ;;  %1099 = vmatmul.mubr.msk.f32.vlgmr.msra.gmra.mxu1 %vm419_vm0, %v364_v7 }
  0x24   : > { %1095 = vmatprep.mubr.msk.f32.mxu0 %vm419_vm0, %v361_v8  ;;  %1101 = vmatprep.mubr.msk.f32.mxu1 %vm419_vm0, %v365_v9 }
  0x25   : > { %396 = vperm.xlu1 %1213, %v374_v15   ;;  %386 = vperm.xlu0 %1212, %v372_v16  }
  0x27   : > { %1096 = vmatmul.mubr.msk.f32.gmra.mxu0 %vm419_vm0, %v362_v12  ;;  %1102 = vmatmul.mubr.msk.f32.gmra.mxu1 %vm419_vm0, %v366_v13 }
  0x29   : > { %406 = vperm.xlu1 %1213, %v376_v17   ;;  %401 = vperm.xlu0 %1212, %v375_v18  }
  0x2d   : > { %416 = vperm.xlu1 %1213, %v378_v19   ;;  %411 = vperm.xlu0 %1212, %v377_v20  }
  0x94   : > { %v392_v21 = vpop.permute.xlu1 %391  ;;  %v382_v22 = vpop.permute.xlu0 %381 }
  0xa0   : > { %v397_v23 = vpop.permute.xlu1 %396  ;;  %v387_v24 = vpop.permute.xlu0 %386 }
  0xa4   : > { %v407_v25 = vpop.permute.xlu1 %406  ;;  %v402_v26 = vpop.permute.xlu0 %401 }
  0xa8   : > { %v417_v33 = vpop.permute.xlu1 %416  ;;  %v412_v38 = vpop.permute.xlu0 %411 }
  0xe3   : > { %v1094_v27 = vpop.f32.mrf.mxu0  ;;  %v1100_v28 = vpop.f32.mrf.mxu1 }
  0xe4   : > { %v516_v29 = vadd.f32 %v1094_v27, %v387_v24  ;;  %v536_v30 = vadd.f32 %v1100_v28, %v407_v25 }
  0xe5   : > { %v510_v31 = vpop.f32.mrf.mxu0  ;;  %v530_v32 = vpop.f32.mrf.mxu1 }
  0xe6   : > { %551 = vst.msk [vmem:[#allocation2 + $0x8] sm:$0xff] %vm549_vm1, %v516_v29  ;;  %555 = vst.msk [vmem:[#allocation2 + $0x28] sm:$0xff] %vm549_vm1, %v536_v30  ;;  %v511_v34 = vadd.f32 %v510_v31, %v382_v22  ;;  %v531_v35 = vadd.f32 %v530_v32, %v402_v26 }
  0xe7   : > { %v1097_v36 = vpop.f32.mrf.mxu0  ;;  %v1103_v37 = vpop.f32.mrf.mxu1 }
  0xe8   : > { %550 = vst.msk [vmem:[#allocation2] sm:$0xff] %vm549_vm1, %v511_v34  ;;  %554 = vst.msk [vmem:[#allocation2 + $0x20] sm:$0xff] %vm549_vm1, %v531_v35  ;;  %v526_v39 = vadd.f32 %v1097_v36, %v397_v23  ;;  %v546_v40 = vadd.f32 %v1103_v37, %v417_v33 }
  0xe9   : > { %v520_v41 = vpop.f32.mrf.mxu0  ;;  %v540_v42 = vpop.f32.mrf.mxu1 }
  0xea   : > { %553 = vst.msk [vmem:[#allocation2 + $0x18] sm:$0xff] %vm549_vm1, %v526_v39  ;;  %557 = vst.msk [vmem:[#allocation2 + $0x38] sm:$0xff] %vm549_vm1, %v546_v40  ;;  %v521_v43 = vadd.f32 %v520_v41, %v392_v21  ;;  %v541_v44 = vadd.f32 %v540_v42, %v412_v38 }
  0xec   : > { %552 = vst.msk [vmem:[#allocation2 + $0x10] sm:$0xff] %vm549_vm1, %v521_v43  ;;  %556 = vst.msk [vmem:[#allocation2 + $0x30] sm:$0xff] %vm549_vm1, %v541_v44 }
  0xed PF: > { %p1042_p0 = scmp.ne.s32.totalorder %s1294_s30, 0 }
  0xef   : > { %560 = sbr.rel (%p1042_p0) target bundleno = 246 (0xf6), region = 60 }
  0xf4   : > { %v1043_v45 = vld [vmem:[%s1603_s7] ss:$0 sm:$0xff]  ;;  %vm568_vm2 = vcmask 261120  }
  0xf5   : > { %569 = vst.msk [vmem:[#allocation3] sm:$0xff] %vm568_vm2, %v1043_v45 }
  0xf6 PF: > { %s1044_s13 = sshll.u32 %s1294_s30, 5  ;;  %v1313_v46 = vmov 0.0   ;;  %vm1314_vm3 = vmmov 0   ;;  %v570_v51 = vld [vmem:[%s1444_s15] sm:$0xff]  ;;  %vm585_vm4 = vcmask 261120   ;;  %s1047_s19 = sshll.u32 %s1294_s30, 3 }
  0xf7   : > { %1104 = vmatprep.subr.mxu0 %v1313_v46  ;;  %s572_s22 = scalar_lea.vmem %s1600_s4, %s1044_s13  ;;  %1112 = vmatprep.mubr.msk.f32.mxu0 %vm1314_vm3, %v1313_v46  ;;  %s661_s20 = scalar_lea.vmem [#allocation2], %s1047_s19  ;;  %vm665_vm5 = vcmask 64512  }
  0xf8   : > { %v576_v47 = vld [vmem:[%s572_s22 + $0x18] sm:$0xff]  ;;  %v575_v48 = vld [vmem:[%s572_s22 + $0x10] sm:$0xff]  ;;  %1115 = vmatprep.subr.mxu1 %v1313_v46  ;;  %1117 = vmatprep.mubr.msk.f32.mxu1 %vm1314_vm3, %v1313_v46  ;;  %v574_v49 = vld [vmem:[%s572_s22 + $0x8] sm:$0xff]  ;;  %s577_s25 = scalar_lea.vmem %s1601_s5, %s1294_s30  ;;  %s827_s13 = scalar_lea.vmem %s1602_s6, %s1047_s19 }
  0xf9   : > { %1105 = vmatpush3.msra.mxu0 %v576_v47  ;;  %v573_v50 = vld [vmem:[%s572_s22] sm:$0xff]  ;;  %p1054_p1 = scmp.ne.s32.totalorder %s1294_s30, 3 }
  0xfa   : > { %1106 = vmatprep.subr.mxu0 %v1313_v46  ;;  %v662_v52 = vld [vmem:[%s661_s20] sm:$0xff]  ;;  %s1613_s14 = scalar_lea.vmem (!%p1054_p1), [#allocation4], %s1434_s23 }
  0xfb   : > { %1107 = vmatpush3.msra.mxu0 %v575_v48  ;;  %1116 = vmatpush3.msra.mxu1 %v662_v52  ;;  %v1045_v53 = vld [vmem:[%s577_s25] ss:$0 sm:$0xff] }
  0xfc   : > { %1108 = vmatprep.subr.mxu0 %v1313_v46  ;;  %1120 = vmatprep.subr.mxu1 %v1313_v46  ;;  %v1049_v56 = vld [vmem:[%s661_s20 + $0x20] sm:$0xff] }
  0xfd   : > { %1109 = vmatpush3.msra.mxu0 %v574_v49  ;;  %v828_v5 = vld [vmem:[%s827_s13] sm:$0xff] }
  0xfe   : > { %1110 = vmatprep.subr.mxu0 %v1313_v46  ;;  %v826_v8 = vld [vmem:[#allocation3] sm:$0xff] }
  0xff   : > { %1111 = vmatpush3.msra.mxu0 %v573_v50 }
 0x100   : > { %1113 = vmatmul.mubr.msk.f32.vlgmr.msra.gmra.mxu0 %vm585_vm4, %v570_v51 }
 0x1c0   : > { %v655_v54 = vpop.f32.mrf.mxu0 }
 0x1c1   : > { %v656_v55 = vadd.f32 %v1045_v53, %v655_v54 }
 0x1c2   : > { %v1114_v57 = vpop.f32.mrf.mxu0 }
 0x1c3   : > { %1118 = vmatmul.mubr.msk.f32.vlgmr.msra.gmra.mxu1 %vm665_vm5, %v656_v55 }
 0x1c4   : > { %1121 = vmatpush3.xpose.msk.msra.mxu1 %vm665_vm5, %v1049_v56  ;;  %1122 = vmatprep.mubr.msk.f32.mxu1 %vm1314_vm3, %v1313_v46 }
 0x1c5   : > { %1125 = vmatprep.subr.mxu1 %v1313_v46 }
 0x283   : > { %v735_v58 = vpop.f32.mrf.mxu1 }
 0x284   : > { %v739_v59 = vsel %vm665_vm5, %v735_v58, -inf }
 0x285   : > { %740 = vmax.xlane.f32.xlu0 %v739_v59  ;;  %v1119_v60 = vpop.f32.mrf.mxu1 }
 0x30e   : > { %v741_v61 = vpop.xlane.xlu0 %740 }
 0x30f   : > { %v742_v62 = vsub.f32 %v735_v58, %v741_v61 }
 0x311   : > { %v743_v63 = vmul.f32 1.442695, %v742_v62 }
 0x313   : > { %1214 = vpow2.f32 %v743_v63 }
 0x320   : > { %v1215_v0 = vpop.eup %1214 }
 0x321   : > { %v745_v1 = vsel %vm665_vm5, %v1215_v0, 0.0 }
 0x322   : > { %746 = vadd.xlane.f32.xlu0 %v745_v1 }
 0x3ab   : > { %v747_v2 = vpop.xlane.xlu0 %746 }
 0x3ac   : > { %1216 = vrcp.f32 %v747_v2 }
 0x3b9   : > { %v1217_v3 = vpop.eup %1216 }
 0x3ba   : > { %v749_v4 = vmul.f32 %v1217_v3, %v1215_v0 }
 0x3bc   : > { %1123 = vmatmul.mubr.msk.f32.vlgmr.msra.gmra.mxu1 %vm665_vm5, %v749_v4 }
 0x3bd   : > { %1126 = vmatpush3.msra.mxu1 %v828_v5  ;;  %1127 = vmatprep.mubr.msk.f32.mxu1 %vm1314_vm3, %v1313_v46 }
 0x47c   : > { %v822_v6 = vpop.f32.mrf.mxu1 }
 0x47d   : > { %1128 = vmatmul.mubr.msk.f32.vlgmr.msra.gmra.mxu1 %vm665_vm5, %v822_v6 }
 0x47e   : > { %v1124_v7 = vpop.f32.mrf.mxu1 }
 0x53c   : > { %907 = sbr.rel (%p1054_p1) target bundleno = 1353 (0x549), region = 64 }
 0x53d   : > { %v898_v9 = vpop.f32.mrf.mxu1 }
 0x53e   : > { %v902_v10 = vadd.f32 %v898_v9, %v826_v8 }
 0x53f   : > { %v1129_v11 = vpop.f32.mrf.mxu1 }
 0x540   : > { %903 = vst.msk [vmem:[#allocation3] sm:$0xff] %vm585_vm4, %v902_v10 }
 0x547   : > { %v908_v12 = vld [vmem:[#allocation3] sm:$0xff] }
 0x548   : > { %909 = vst.msk [vmem:[%s1613_s14] sm:$0xff] %vm585_vm4, %v908_v12 }
 0x549 PF: > { %s1056_s11 = sshll.u32 %s1298_s9, 7  ;;  %s1614_s16 = scalar_lea.vmem [#allocation4], %s1434_s23 }
 0x54a   : > { %s923_s20 = scalar_lea.hbm %s1604_s8, %s1056_s11  ;;  %s925_s24 = sshll.u32 %s1614_s16, 4  ;;  %s926_s24 = int_to_ptr.vmem [resolvable:$true] %s925_s24 }
 0x54b   : > { %s1615_s30 = sand.u32 1, %s1286_s28   ;;  %s1218_s15 = scalar_lea.vmem %s926_s24, 128 }
 0x54c   : > { %s911_s25 = scalar_lea.sflag [#allocation5], %s1615_s30  ;;  %p1219_p2 = scmp.ne.s32.totalorder %s926_s24, %s1218_s15 }
 0x54d   : > { %s1315_s26 = smov [#allocation4]  }
 0x54e   : > { %p1220_p4 = pnand %p1219_p2, %p1410_p3  ;;  %s1222_s13 = sshll.u32 %s1315_s26, 4  ;;  %s1223_s13 = int_to_ptr.vmem [resolvable:$false] %s1222_s13 }
 0x54f   : > { %s1224_s14 = scalar_lea.vmem %s1223_s13, 256  ;;  %p1225_p6 = scmp.lt.s32.totalorder %s926_s24, %s1223_s13 }
 0x550   : > { %p1221_p5 = pneg %p1220_p4  ;;  %p1226_p7 = scmp.lt.s32.totalorder %s1224_s14, %s1218_s15 }
 0x552   : > { %p1227_p8 = por %p1226_p7, %p1225_p6 }
 0x554   : > { %p1228_p10 = pnand %p1227_p8, %p1221_p5 }
 0x556   : > { %1231 = shalt.err (!%p1228_p10)
}
 0x557   : > { %s1232_s9 = scalar_lea.hbm %s923_s20, 128  ;;  %s1236_s22 = scalar_lea.hbm %s1604_s8, 256 }
 0x558   : > { %p1233_p11 = scmp.ne.s32.totalorder %s923_s20, %s1232_s9  ;;  %p1237_p0 = scmp.lt.s32.totalorder %s923_s20, %s1604_s8 }
 0x559   : > { %p1238_p1 = scmp.lt.s32.totalorder %s1236_s22, %s1232_s9 }
 0x55a   : > { %p1234_p12 = pnand %p1233_p11, %p1410_p3 }
 0x55b   : > { %p1239_p2 = por %p1238_p1, %p1237_p0 }
 0x55c   : > { %p1235_p13 = pneg %p1234_p12 }
 0x55e   : > { %p1240_p4 = pnand %p1239_p2, %p1235_p13 }
 0x560   : > { %1243 = shalt.err (!%p1240_p4)
}
 0x561   : > { %1138 = dma.vmem_to_hbm [thread:$0]  (%p1410_p3), %s926_s24, 128, %s923_s20, %s911_s25  }
 0x562 PF: > { %p1144_p5 = scmp.ge.s32.totalorder %s1310_s12, 2  ;;  %s937_s30 = sand.u32 1, %s1282_s27  }
 0x563   : > { %s938_s15 = scalar_lea.sflag [#allocation5], %s937_s30 }
 0x564   : > { %p1141_p6 = pnand %p1144_p5, %p1420_p9 }
 0x566   : > { %p1142_p7 = pneg %p1141_p6 }
 0x568   : > { %1277 = dma.done.wait (%p1142_p7), %s938_s15, 128  }
 0x569   : > { %1279 = vsyncadd (%p1142_p7), %s938_s15, 4294967168  ;;  %s21_s12 = sadd.s32 1, %s1310_s12   ;;  %s1616_s9 = sld [smem:[#allocation7_spill]] }
 0x56a   : > { %p18_p8 = scmp.ge.s32.totalorder %s21_s12, 10   ;;  %s1617_s17 = sld [smem:[#allocation8_spill]] }
 0x56b   : > { %s1618_s11 = sld [smem:[#allocation9_spill]]  ;;  %s1619_s27 = smov %s1286_s28 }
 0x56c   : > { %s1620_s28 = smov %s1290_s29  ;;  %s1621_s29 = smov %s1428_s21 }
 0x56d   : > { %s1622_s30 = smov %s1302_s10  ;;  %20 = sbr.rel (!%p18_p8) target bundleno = 5 (0x5), region = 107 }
 0x570   : > { %s1623_s10 = smov %s1617_s17 }
 0x572   :  { %943 = vsyncpa [#allocation5], 1 }
 0x573   :  { %945 = vsyncpa [#allocation5 + $0x1], 1 }

</bundles_post_ra>
